<compile_context>
chip_gen: v7x
topology: tpu7x:2x2x1
jax: 0.10.0
libtpu: 0.0.40
codegen_flags: <defaults>
</compile_context>

<pallas_src>
import functools

import jax
import jax.numpy as jnp
from jax.experimental import pallas as pl
from jax.experimental.pallas import tpu as pltpu


def _round_up(x, m):
    return (x + m - 1) // m * m


def _critic_mlp_kernel(num_layers, compute_dtype, *refs):
    """Fused MLP: num_layers (Linear -> Tanh) + padded linear output head.

    refs = (x_ref, W0, b0, ..., W_L, b_L, o_ref).  x/out are (TB, feat) batch
    tiles; weights/biases are whole (padded) arrays, VMEM-resident across the
    batch grid.  Matmuls run on the MXU with f32 accumulation; bias adds and
    tanh stay in f32 (VPU/EUP).
    """
    x_ref = refs[0]
    o_ref = refs[-1]
    p = refs[1:-1]

    h = x_ref[...].astype(jnp.float32)
    for i in range(num_layers + 1):
        w = p[2 * i][...]                                   # compute_dtype
        b = p[2 * i + 1][...].astype(jnp.float32)
        acc = jnp.dot(h.astype(compute_dtype), w,
                      preferred_element_type=jnp.float32) + b
        h = jnp.tanh(acc) if i < num_layers else acc
    o_ref[...] = h.astype(o_ref.dtype)


def init_critic_params(key, input_dim, hidden_size, num_layers, dtype=jnp.float32):
    """Deterministic params matching the PyTorch module shapes.

    Weights stored (in_features, out_features) so the kernel computes h @ W + b
    (== PyTorch x @ W.T + b with W of shape (out, in))."""
    params = []
    dims_in = [input_dim] + [hidden_size] * num_layers
    dims_out = [hidden_size] * num_layers + [1]
    for d_in, d_out in zip(dims_in, dims_out):
        key, kw, kb = jax.random.split(key, 3)
        bound = 1.0 / float(d_in) ** 0.5
        w = jax.random.uniform(kw, (d_in, d_out), dtype, -bound, bound)
        b = jax.random.uniform(kb, (1, d_out), dtype, -bound, bound)
        params += [w, b]
    return params


def _auto_batch_tile(B, in_p, hid_p, out_p, x_itemsize, w_itemsize,
                     weight_bytes, budget_bytes=24 * 2**20):
    """Largest batch tile (mult of 8, <=512) fitting a conservative VMEM budget."""
    per_row = (2 * (in_p * x_itemsize + out_p * 4)
               + (max(in_p, hid_p) + hid_p) * (4 + w_itemsize))
    avail = max(budget_bytes - 2 * weight_bytes, per_row * 8)
    tile = min(512, avail // per_row)
    return max(8, int(tile // 8) * 8)


def critic_forward(state_action, params, *, batch_tile=None,
                   compute_dtype=jnp.bfloat16, lane=128):
    """Runs the fused, batch-tiled MLP Pallas kernel. state_action: (B, input_dim)."""
    num_layers = len(params) // 2 - 1
    B, in_dim = state_action.shape
    out_dim = params[-1].shape[-1]  # == 1

    # ---- host-side zero padding: MXU-shaped matmuls + lane-dense output ----
    dims_in = [w.shape[0] for w in params[0::2]]
    dims_out = [w.shape[1] for w in params[0::2]]
    dims_in_p = [_round_up(d, lane) for d in dims_in]
    dims_out_p = [_round_up(d, lane) for d in dims_out]

    packed = []
    for w, b, dip, dop in zip(params[0::2], params[1::2], dims_in_p, dims_out_p):
        packed.append(
            jnp.pad(w, ((0, dip - w.shape[0]), (0, dop - w.shape[1])))
            .astype(compute_dtype))
        packed.append(
            jnp.pad(b, ((0, 0), (0, dop - b.shape[1]))).astype(jnp.float32))

    in_p = dims_in_p[0]
    out_p = dims_out_p[-1]
    hid_p = dims_out_p[0] if num_layers > 0 else in_p

    # ---- batch tiling -------------------------------------------------------
    x_itemsize = state_action.dtype.itemsize
    w_itemsize = jnp.dtype(compute_dtype).itemsize
    weight_bytes = sum(int(p.size) * p.dtype.itemsize for p in packed)
    if batch_tile is None:
        batch_tile = _auto_batch_tile(B, in_p, hid_p, out_p,
                                      x_itemsize, w_itemsize, weight_bytes)
    batch_tile = max(8, min(_round_up(batch_tile, 8), _round_up(B, 8)))
    B_p = _round_up(B, batch_tile)
    grid = (B_p // batch_tile,)

    x_p = jnp.pad(state_action, ((0, B_p - B), (0, in_p - in_dim)))

    # ---- specs --------------------------------------------------------------
    x_spec = pl.BlockSpec((batch_tile, in_p), lambda i: (i, 0))
    param_specs = [pl.BlockSpec(p.shape, lambda i: (0, 0)) for p in packed]
    out_spec = pl.BlockSpec((batch_tile, out_p), lambda i: (i, 0))

    # ---- VMEM budget + cost hint -------------------------------------------
    act_bytes = batch_tile * (2 * (in_p * x_itemsize + out_p * 4)
                              + (max(in_p, hid_p) + hid_p) * (4 + w_itemsize))
    vmem_est = 2 * weight_bytes + act_bytes
    vmem_limit = int(min(max(2 * vmem_est, 32 * 2**20), 48 * 2**20))

    flops = int(2 * B_p * sum(di * do for di, do in zip(dims_in_p, dims_out_p)))
    transcendentals = int(B_p * hid_p * num_layers)
    bytes_accessed = int(B_p * in_p * x_itemsize + weight_bytes
                         + B_p * out_p * x_itemsize)

    kernel = functools.partial(_critic_mlp_kernel, num_layers, compute_dtype)
    out_padded = pl.pallas_call(
        kernel,
        out_shape=jax.ShapeDtypeStruct((B_p, out_p), state_action.dtype),
        grid=grid,
        in_specs=[x_spec] + param_specs,
        out_specs=out_spec,
        compiler_params=pltpu.CompilerParams(
            dimension_semantics=("parallel",),
            vmem_limit_bytes=vmem_limit),
        cost_estimate=pl.CostEstimate(flops=flops,
                                      transcendentals=transcendentals,
                                      bytes_accessed=bytes_accessed),
    )(x_p, *packed)

    return out_padded[:B, :out_dim]


def critic_forward_ref(state_action, params, compute_dtype=jnp.bfloat16):
    """Pure-JAX reference with the same dtype policy as the kernel."""
    num_layers = len(params) // 2 - 1
    h = state_action.astype(jnp.float32)
    for i in range(num_layers + 1):
        w = params[2 * i].astype(compute_dtype)
        b = params[2 * i + 1].astype(jnp.float32)
        acc = jnp.dot(h.astype(compute_dtype), w,
                      preferred_element_type=jnp.float32) + b
        h = jnp.tanh(acc) if i < num_layers else acc
    return h.astype(state_action.dtype)


if __name__ == "__main__":
    # Small synthetic shapes: batch=256 (4 grid steps of 64), obs+act dim=24,
    # hidden=64, 2 Tanh layers -> scalar Q value.
    batch = 256
    input_dim = 24
    hidden_size = 64
    num_layers = 2

    key = jax.random.PRNGKey(0)
    key, k_x = jax.random.split(key)
    state_action = jax.random.normal(k_x, (batch, input_dim), dtype=jnp.float32)
    params = init_critic_params(key, input_dim, hidden_size, num_layers)

    # Default path: bf16 matmul operands, f32 accumulation / tanh.
    fwd_bf16 = jax.jit(functools.partial(critic_forward, batch_tile=64))
    out = jax.block_until_ready(fwd_bf16(state_action, params))
    ref = critic_forward_ref(state_action, params, compute_dtype=jnp.bfloat16)
    assert out.shape == (batch, 1), out.shape
    assert float(jnp.max(jnp.abs(out - ref))) < 2e-3

    # f32 path reproduces the PyTorch module numerics exactly.
    fwd_f32 = jax.jit(functools.partial(critic_forward, batch_tile=64,
                                        compute_dtype=jnp.float32))
    out32 = jax.block_until_ready(fwd_f32(state_action, params))
    ref32 = critic_forward_ref(state_action, params, compute_dtype=jnp.float32)
    assert out32.shape == (batch, 1), out32.shape
    assert jnp.allclose(out32, ref32, atol=1e-5, rtol=1e-5)

    print("KERNEL_OK")
</pallas_src>

<mosaic_0001>
module attributes {stable_mosaic.version = 11 : i64} {
  func.func @_critic_mlp_kernel(%arg0: i32, %arg1: memref<64x128xf32, #tpu.memory_space<vmem>>, %arg2: memref<128x128xbf16, #tpu.memory_space<vmem>>, %arg3: memref<1x128xf32, #tpu.memory_space<vmem>>, %arg4: memref<128x128xbf16, #tpu.memory_space<vmem>>, %arg5: memref<1x128xf32, #tpu.memory_space<vmem>>, %arg6: memref<128x128xbf16, #tpu.memory_space<vmem>>, %arg7: memref<1x128xf32, #tpu.memory_space<vmem>>, %arg8: memref<64x128xf32, #tpu.memory_space<vmem>>) attributes {dimension_semantics = [#tpu.dimension_semantics<parallel>], iteration_bounds = array<i64: 4>, scalar_prefetch = 0 : i64, scratch_operands = 0 : i64, tpu.core_type = #tpu.core_type<tc>, window_params = [{transform_indices = @transform_0, window_bounds = array<i64: 64, 128>}, {pipeline_mode = #tpu.pipeline_mode<synchronous>, transform_indices = @transform_1, window_bounds = array<i64: 128, 128>}, {pipeline_mode = #tpu.pipeline_mode<synchronous>, transform_indices = @transform_2, window_bounds = array<i64: 1, 128>}, {pipeline_mode = #tpu.pipeline_mode<synchronous>, transform_indices = @transform_3, window_bounds = array<i64: 128, 128>}, {pipeline_mode = #tpu.pipeline_mode<synchronous>, transform_indices = @transform_4, window_bounds = array<i64: 1, 128>}, {pipeline_mode = #tpu.pipeline_mode<synchronous>, transform_indices = @transform_5, window_bounds = array<i64: 128, 128>}, {pipeline_mode = #tpu.pipeline_mode<synchronous>, transform_indices = @transform_6, window_bounds = array<i64: 1, 128>}, {transform_indices = @transform_7, window_bounds = array<i64: 64, 128>}]} {
    %c0 = arith.constant 0 : index
    %c0_0 = arith.constant 0 : index
    %0 = vector.load %arg1[%c0, %c0_0] : memref<64x128xf32, #tpu.memory_space<vmem>>, vector<64x128xf32>
    %c0_1 = arith.constant 0 : index
    %c0_2 = arith.constant 0 : index
    %1 = vector.load %arg2[%c0_1, %c0_2] : memref<128x128xbf16, #tpu.memory_space<vmem>>, vector<128x128xbf16>
    %c0_3 = arith.constant 0 : index
    %c0_4 = arith.constant 0 : index
    %2 = vector.load %arg3[%c0_3, %c0_4] : memref<1x128xf32, #tpu.memory_space<vmem>>, vector<1x128xf32>
    %3 = arith.truncf %0 : vector<64x128xf32> to vector<64x128xbf16>
    %cst = arith.constant dense<0.000000e+00> : vector<64x128xf32>
    %4 = tpu.matmul %3, %1, %cst {dimension_numbers = #tpu.dot_dimension_numbers<[1], [0], [0], [1], [0, 0, 1, 1], [], []>} : vector<64x128xbf16>, vector<128x128xbf16>, vector<64x128xf32> -> vector<64x128xf32>
    %5 = vector.broadcast %2 : vector<1x128xf32> to vector<64x128xf32>
    %6 = arith.addf %4, %5 : vector<64x128xf32>
    %7 = math.tanh %6 : vector<64x128xf32>
    %c0_5 = arith.constant 0 : index
    %c0_6 = arith.constant 0 : index
    %8 = vector.load %arg4[%c0_5, %c0_6] : memref<128x128xbf16, #tpu.memory_space<vmem>>, vector<128x128xbf16>
    %c0_7 = arith.constant 0 : index
    %c0_8 = arith.constant 0 : index
    %9 = vector.load %arg5[%c0_7, %c0_8] : memref<1x128xf32, #tpu.memory_space<vmem>>, vector<1x128xf32>
    %10 = arith.truncf %7 : vector<64x128xf32> to vector<64x128xbf16>
    %cst_9 = arith.constant dense<0.000000e+00> : vector<64x128xf32>
    %11 = tpu.matmul %10, %8, %cst_9 {dimension_numbers = #tpu.dot_dimension_numbers<[1], [0], [0], [1], [0, 0, 1, 1], [], []>} : vector<64x128xbf16>, vector<128x128xbf16>, vector<64x128xf32> -> vector<64x128xf32>
    %12 = vector.broadcast %9 : vector<1x128xf32> to vector<64x128xf32>
    %13 = arith.addf %11, %12 : vector<64x128xf32>
    %14 = math.tanh %13 : vector<64x128xf32>
    %c0_10 = arith.constant 0 : index
    %c0_11 = arith.constant 0 : index
    %15 = vector.load %arg6[%c0_10, %c0_11] : memref<128x128xbf16, #tpu.memory_space<vmem>>, vector<128x128xbf16>
    %c0_12 = arith.constant 0 : index
    %c0_13 = arith.constant 0 : index
    %16 = vector.load %arg7[%c0_12, %c0_13] : memref<1x128xf32, #tpu.memory_space<vmem>>, vector<1x128xf32>
    %17 = arith.truncf %14 : vector<64x128xf32> to vector<64x128xbf16>
    %cst_14 = arith.constant dense<0.000000e+00> : vector<64x128xf32>
    %18 = tpu.matmul %17, %15, %cst_14 {dimension_numbers = #tpu.dot_dimension_numbers<[1], [0], [0], [1], [0, 0, 1, 1], [], []>} : vector<64x128xbf16>, vector<128x128xbf16>, vector<64x128xf32> -> vector<64x128xf32>
    %19 = vector.broadcast %16 : vector<1x128xf32> to vector<64x128xf32>
    %20 = arith.addf %18, %19 : vector<64x128xf32>
    %c0_15 = arith.constant 0 : index
    %c0_16 = arith.constant 0 : index
    %21 = vector.load %arg8[%c0_15, %c0_16] : memref<64x128xf32, #tpu.memory_space<vmem>>, vector<64x128xf32>
    tpu.vector_store %arg8[%c0_15, %c0_16], %20 {strides = array<i32>} : memref<64x128xf32, #tpu.memory_space<vmem>>, vector<64x128xf32>,
    return
  }
  func.func @transform_0(%arg0: i32) -> (i32, i32) {
    %c0_i32 = arith.constant 0 : i32
    %c0_i32_0 = arith.constant 0 : i32
    return %arg0, %c0_i32 : i32, i32
  }
  func.func @transform_1(%arg0: i32) -> (i32, i32) {
    %c0_i32 = arith.constant 0 : i32
    %c0_i32_0 = arith.constant 0 : i32
    %c0_i32_1 = arith.constant 0 : i32
    return %c0_i32, %c0_i32_0 : i32, i32
  }
  func.func @transform_2(%arg0: i32) -> (i32, i32) {
    %c0_i32 = arith.constant 0 : i32
    %c0_i32_0 = arith.constant 0 : i32
    %c0_i32_1 = arith.constant 0 : i32
    return %c0_i32, %c0_i32_0 : i32, i32
  }
  func.func @transform_3(%arg0: i32) -> (i32, i32) {
    %c0_i32 = arith.constant 0 : i32
    %c0_i32_0 = arith.constant 0 : i32
    %c0_i32_1 = arith.constant 0 : i32
    return %c0_i32, %c0_i32_0 : i32, i32
  }
  func.func @transform_4(%arg0: i32) -> (i32, i32) {
    %c0_i32 = arith.constant 0 : i32
    %c0_i32_0 = arith.constant 0 : i32
    %c0_i32_1 = arith.constant 0 : i32
    return %c0_i32, %c0_i32_0 : i32, i32
  }
  func.func @transform_5(%arg0: i32) -> (i32, i32) {
    %c0_i32 = arith.constant 0 : i32
    %c0_i32_0 = arith.constant 0 : i32
    %c0_i32_1 = arith.constant 0 : i32
    return %c0_i32, %c0_i32_0 : i32, i32
  }
  func.func @transform_6(%arg0: i32) -> (i32, i32) {
    %c0_i32 = arith.constant 0 : i32
    %c0_i32_0 = arith.constant 0 : i32
    %c0_i32_1 = arith.constant 0 : i32
    return %c0_i32, %c0_i32_0 : i32, i32
  }
  func.func @transform_7(%arg0: i32) -> (i32, i32) {
    %c0_i32 = arith.constant 0 : i32
    %c0_i32_0 = arith.constant 0 : i32
    return %arg0, %c0_i32 : i32, i32
  }
}

</mosaic_0001>

<bundles_post_ra>
// kernel: critic_forward.1
= control target key start
LH: loop header
LB: loop body
LE: loop exit
PB: predicated region body
PF: predicated region fallthrough
CT: control target
= control target key end

     0   :  { %s1065_s24 = smov 0   ;;  %s1180_s0 = inlined_call_operand.vmem [shape: f32[256,128], index: 0, kind: input, shape index: {}]   ;;  %s1181_s1 = inlined_call_operand.vmem [shape: bf16[128,128], index: 1, kind: input, shape index: {}]   ;;  %s1182_s2 = inlined_call_operand.vmem [shape: f32[1,128], index: 2, kind: input, shape index: {}]   ;;  %s1183_s3 = inlined_call_operand.vmem [shape: bf16[128,128], index: 3, kind: input, shape index: {}]   ;;  %s1184_s4 = inlined_call_operand.vmem [shape: f32[1,128], index: 4, kind: input, shape index: {}]   ;;  %s1185_s5 = inlined_call_operand.vmem [shape: bf16[128,128], index: 5, kind: input, shape index: {}]   ;;  %s1186_s6 = inlined_call_operand.vmem [shape: f32[1,128], index: 6, kind: input, shape index: {}]   ;;  %s1187_s7 = inlined_call_operand.vmem [shape: f32[256,128], index: 7, kind: output, shape index: {}]  }
   0x1 LB: > { %s791_s25 = sadd.s32 4294967295, %s1023_s24   ;;  %p795_p0 = scmp.ge.s32.totalorder %s1023_s24, 1  ;;  %s1023_s24 = sphi %s1065_s24, %s17_s24  }
   0x2   : > { %p238_p1 = scmp.lt.s32.totalorder %s1023_s24, 5 }
   0x4   : > { %p239_p2 = pnand %p795_p0, %p238_p1 }
   0x5   : > { %v961_v0 = vld [vmem:[%s1181_s1] sm:$0xff] (!%p239_p2)   ;;  %s796_s28 = sshll.u32 (!%p239_p2), %s791_s25, 3  ;;  %v962_v1 = vld [vmem:[%s1181_s1 + $0x8] sm:$0xff] (!%p239_p2)   ;;  %v963_v2 = vld [vmem:[%s1181_s1 + $0x10] sm:$0xff] (!%p239_p2)  }
   0x6   : > { %242 = sbr.rel (%p239_p2) target bundleno = 726 (0x2d6), region = 48  ;;  %p271_p3 = scmp.lt.s32.totalorder (!%p239_p2), %s796_s28, 31  ;;  %865 = vmatprep.subr.bf16.mxu0 (!%p239_p2), %v961_v0  ;;  %v964_v3 = vld [vmem:[%s1181_s1 + $0x18] sm:$0xff] (!%p239_p2)   ;;  %v965_v7 = vld [vmem:[%s1181_s1 + $0x20] sm:$0xff] (!%p239_p2)   ;;  %v970_v9 = vld [vmem:[%s1183_s3 + $0x8] sm:$0xff] (!%p239_p2)  }
   0x7   : > { %866 = vmatpush3.bf16.msra.mxu0 (!%p239_p2), %v961_v0  ;;  %v969_v8 = vld [vmem:[%s1183_s3] sm:$0xff] (!%p239_p2)   ;;  %v971_v10 = vld [vmem:[%s1183_s3 + $0x10] sm:$0xff] (!%p239_p2)   ;;  %v966_v11 = vld [vmem:[%s1181_s1 + $0x28] sm:$0xff] (!%p239_p2)  }
   0x8   : > { %867 = vmatprep.subr.bf16.mxu0 (!%p239_p2), %v962_v1  ;;  %889 = vmatprep.subr.bf16.mxu1 (!%p239_p2), %v969_v8  ;;  %v967_v12 = vld [vmem:[%s1181_s1 + $0x30] sm:$0xff] (!%p239_p2)   ;;  %v968_v13 = vld [vmem:[%s1181_s1 + $0x38] sm:$0xff] (!%p239_p2)   ;;  %v973_v24 = vld [vmem:[%s1183_s3 + $0x20] sm:$0xff] (!%p239_p2)  }
   0x9   : > { %890 = vmatpush3.bf16.msra.mxu1 (!%p239_p2), %v969_v8  ;;  %v972_v23 = vld [vmem:[%s1183_s3 + $0x18] sm:$0xff] (!%p239_p2)   ;;  %v974_v25 = vld [vmem:[%s1183_s3 + $0x28] sm:$0xff] (!%p239_p2)   ;;  %v975_v26 = vld [vmem:[%s1183_s3 + $0x30] sm:$0xff] (!%p239_p2)  }
   0xa   : > { %891 = vmatprep.subr.bf16.mxu1 (!%p239_p2), %v970_v9  ;;  %v976_v27 = vld [vmem:[%s1183_s3 + $0x38] sm:$0xff] (!%p239_p2)   ;;  %v977_v28 = vld [vmem:[%s1185_s5] sm:$0xff] (!%p239_p2)   ;;  %v978_v29 = vld [vmem:[%s1185_s5 + $0x8] sm:$0xff] (!%p239_p2)  }
   0xb   : > { %868 = vmatpush3.bf16.msra.mxu0 (!%p239_p2), %v962_v1  ;;  %v979_v30 = vld [vmem:[%s1185_s5 + $0x10] sm:$0xff] (!%p239_p2)   ;;  %v800_v31 = vld [vmem:[%s1182_s2] ss:$0 sm:$0xff] (!%p239_p2)  ;;  %v980_v60 = vld [vmem:[%s1185_s5 + $0x18] sm:$0xff] (!%p239_p2)  }
   0xc   : > { %869 = vmatprep.subr.bf16.mxu0 (!%p239_p2), %v963_v2  ;;  %v981_v61 = vld [vmem:[%s1185_s5 + $0x20] sm:$0xff] (!%p239_p2)   ;;  %v982_v62 = vld [vmem:[%s1185_s5 + $0x28] sm:$0xff] (!%p239_p2)   ;;  %v983_v63 = vld [vmem:[%s1185_s5 + $0x30] sm:$0xff] (!%p239_p2)  }
   0xd   : > { %s1189_s28 = smov (!%p271_p3, %s796_s28), 31  ;;  %892 = vmatpush3.bf16.msra.mxu1 %v970_v9  ;;  %v984_v0 = vld [vmem:[%s1185_s5 + $0x38] sm:$0xff]   ;;  %v809_v1 = vld [vmem:[%s1184_s4] ss:$0 sm:$0xff] }
   0xe   : > { %s797_s10 = sshll.u32 %s1189_s28, 3  ;;  %893 = vmatprep.subr.bf16.mxu1 %v971_v10 }
   0xf   : > { %s1090_s13 = scalar_lea.vmem %s1180_s0, %s797_s10  ;;  %870 = vmatpush3.bf16.msra.mxu0 %v963_v2  ;;  %s280_s25 = scalar_lea.vmem %s1187_s7, %s797_s10 }
  0x10   : > { %v283_v4 = vld [vmem:[%s1090_s13] sm:$0xff]  ;;  %v284_v5 = vld [vmem:[%s1090_s13 + $0x8] sm:$0xff]  ;;  %871 = vmatprep.subr.bf16.mxu0 %v964_v3  ;;  %v285_v14 = vld [vmem:[%s1090_s13 + $0x10] sm:$0xff] }
  0x11   : > { %v308_v6 = vpack.c.bf16 %v284_v5, %v283_v4  ;;  %894 = vmatpush3.bf16.msra.mxu1 %v971_v10  ;;  %v286_v15 = vld [vmem:[%s1090_s13 + $0x18] sm:$0xff]  ;;  %v287_v16 = vld [vmem:[%s1090_s13 + $0x20] sm:$0xff]  ;;  %v288_v17 = vld [vmem:[%s1090_s13 + $0x28] sm:$0xff] }
  0x12   : > { %v309_v18 = vpack.c.bf16 %v286_v15, %v285_v14  ;;  %v310_v19 = vpack.c.bf16 %v288_v17, %v287_v16  ;;  %v289_v20 = vld [vmem:[%s1090_s13 + $0x30] sm:$0xff]  ;;  %v290_v21 = vld [vmem:[%s1090_s13 + $0x38] sm:$0xff]  ;;  %895 = vmatprep.subr.bf16.mxu1 %v972_v23 }
  0x13   : > { %881 = vmatprep.mubr.bf16.mxu0 %v308_v6  ;;  %872 = vmatpush3.bf16.msra.mxu0 %v964_v3  ;;  %v311_v22 = vpack.c.bf16 %v290_v21, %v289_v20 }
  0x14   : > { %873 = vmatprep.subr.bf16.mxu0 %v965_v7 }
  0x15   : > { %896 = vmatpush3.bf16.msra.mxu1 %v972_v23 }
  0x16   : > { %897 = vmatprep.subr.bf16.mxu1 %v973_v24 }
  0x17   : > { %874 = vmatpush3.bf16.msra.mxu0 %v965_v7 }
  0x18   : > { %875 = vmatprep.subr.bf16.mxu0 %v966_v11 }
  0x19   : > { %898 = vmatpush3.bf16.msra.mxu1 %v973_v24 }
  0x1a   : > { %899 = vmatprep.subr.bf16.mxu1 %v974_v25 }
  0x1b   : > { %876 = vmatpush3.bf16.msra.mxu0 %v966_v11 }
  0x1c   : > { %877 = vmatprep.subr.bf16.mxu0 %v967_v12 }
  0x1d   : > { %900 = vmatpush3.bf16.msra.mxu1 %v974_v25 }
  0x1e   : > { %901 = vmatprep.subr.bf16.mxu1 %v975_v26 }
  0x1f   : > { %878 = vmatpush3.bf16.msra.mxu0 %v967_v12 }
  0x20   : > { %879 = vmatprep.subr.bf16.mxu0 %v968_v13 }
  0x21   : > { %902 = vmatpush3.bf16.msra.mxu1 %v975_v26 }
  0x22   : > { %903 = vmatprep.subr.bf16.mxu1 %v976_v27 }
  0x23   : > { %880 = vmatpush3.bf16.msra.mxu0 %v968_v13 }
  0x24   : > { %913 = vmatprep.subr.bf16.mxu0 %v977_v28 }
  0x25   : > { %904 = vmatpush3.bf16.msra.mxu1 %v976_v27 }
  0x26   : > { %882 = vmatmul.mubr.bf16.vlgmr.msra.gmra.mrb[0].mxu0 %v309_v18  ;;  %937 = vmatprep.subr.bf16.mxu1 %v977_v28 }
  0x27   : > { %885 = vmatprep.mubr.bf16.mxu0 %v310_v19  ;;  %914 = vmatpush3.bf16.msra.mxu0 %v977_v28 }
  0x28   : > { %915 = vmatprep.subr.bf16.mxu0 %v978_v29 }
  0x2b   : > { %916 = vmatpush3.bf16.msra.mxu0 %v978_v29 }
  0x2c   : > { %917 = vmatprep.subr.bf16.mxu0 %v979_v30 }
  0x2e   : > { %886 = vmatmul.mubr.bf16.gmra.mrb[4].mxu0 %v311_v22 }
  0x2f   : > { %918 = vmatpush3.bf16.msra.mxu0 %v979_v30 }
  0x30   : > { %919 = vmatprep.subr.bf16.mxu0 %v980_v60 }
  0x33   : > { %920 = vmatpush3.bf16.msra.mxu0 %v980_v60 }
  0x34   : > { %921 = vmatprep.subr.bf16.mxu0 %v981_v61 }
  0x37   : > { %922 = vmatpush3.bf16.msra.mxu0 %v981_v61 }
  0x38   : > { %923 = vmatprep.subr.bf16.mxu0 %v982_v62 }
  0x3b   : > { %924 = vmatpush3.bf16.msra.mxu0 %v982_v62 }
  0x3c   : > { %925 = vmatprep.subr.bf16.mxu0 %v983_v63 }
  0x3f   : > { %926 = vmatpush3.bf16.msra.mxu0 %v983_v63 }
  0x40   : > { %927 = vmatprep.subr.bf16.mxu0 %v984_v0 }
  0x43   : > { %928 = vmatpush3.bf16.msra.mxu0 %v984_v0 }
  0xf9   : > { %v883_v32 = vpop.f32.mrb[0].mxu0 }
  0xfa   : > { %v409_v33 = vadd.f32 %v883_v32, %v800_v31  ;;  %v400_v34 = vpop.f32.mrb[1].mxu0 }
  0xfb   : > { %v401_v35 = vadd.f32 %v800_v31, %v400_v34  ;;  %v884_v36 = vpop.f32.mrb[2].mxu0 }
  0xfc   : > { %985 = vtanh.f32 %v409_v33  ;;  %v412_v37 = vadd.f32 %v884_v36, %v800_v31  ;;  %v403_v38 = vpop.f32.mrb[3].mxu0 }
  0xfd   : > { %987 = vtanh.f32 %v401_v35  ;;  %v404_v39 = vadd.f32 %v800_v31, %v403_v38 }
  0xfe   : > { %989 = vtanh.f32 %v412_v37 }
  0xff   : > { %991 = vtanh.f32 %v404_v39 }
 0x101   : > { %v887_v40 = vpop.f32.mrb[4].mxu0 }
 0x102   : > { %v425_v41 = vadd.f32 %v887_v40, %v800_v31  ;;  %v416_v42 = vpop.f32.mrb[5].mxu0 }
 0x103   : > { %v417_v43 = vadd.f32 %v800_v31, %v416_v42  ;;  %v888_v44 = vpop.f32.mrb[6].mxu0 }
 0x104   : > { %993 = vtanh.f32 %v425_v41  ;;  %v428_v45 = vadd.f32 %v888_v44, %v800_v31  ;;  %v419_v46 = vpop.f32.mrb[7].mxu0 }
 0x105   : > { %995 = vtanh.f32 %v417_v43  ;;  %v420_v47 = vadd.f32 %v800_v31, %v419_v46 }
 0x106   : > { %v986_v48 = vpop.eup %985  ;;  %997 = vtanh.f32 %v428_v45 }
 0x107   : > { %v988_v49 = vpop.eup %987  ;;  %999 = vtanh.f32 %v420_v47 }
 0x108   : > { %v990_v50 = vpop.eup %989 }
 0x109   : > { %v992_v51 = vpop.eup %991  ;;  %v457_v52 = vpack.c.bf16 %v990_v50, %v986_v48 }
 0x10a   : > { %v456_v53 = vpack.c.bf16 %v992_v51, %v988_v49 }
 0x10c   : > { %905 = vmatprep.mubr.bf16.mxu1 %v456_v53 }
 0x10d   : > { %906 = vmatmul.mubr.bf16.vlgmr.msra.gmra.mrb[0].mxu1 %v457_v52 }
 0x10e   : > { %v994_v54 = vpop.eup %993  ;;  %945 = vmatpush3.bf16.msra.mxu1 %v977_v28 }
 0x10f   : > { %v996_v55 = vpop.eup %995  ;;  %938 = vmatprep.subr.bf16.mxu1 %v978_v29 }
 0x110   : > { %v998_v56 = vpop.eup %997 }
 0x111   : > { %v1000_v57 = vpop.eup %999  ;;  %v459_v58 = vpack.c.bf16 %v998_v56, %v994_v54 }
 0x112   : > { %v458_v59 = vpack.c.bf16 %v1000_v57, %v996_v55  ;;  %946 = vmatpush3.bf16.msra.mxu1 %v978_v29 }
 0x113   : > { %939 = vmatprep.subr.bf16.mxu1 %v979_v30 }
 0x114   : > { %909 = vmatprep.mubr.bf16.mxu1 %v458_v59 }
 0x115   : > { %910 = vmatmul.mubr.bf16.gmra.mrb[4].mxu1 %v459_v58 }
 0x116   : > { %947 = vmatpush3.bf16.msra.mxu1 %v979_v30  ;;  %v818_v30 = vld [vmem:[%s1186_s6] ss:$0 sm:$0xff] }
 0x117   : > { %940 = vmatprep.subr.bf16.mxu1 %v980_v60 }
 0x11a   : > { %948 = vmatpush3.bf16.msra.mxu1 %v980_v60 }
 0x11b   : > { %941 = vmatprep.subr.bf16.mxu1 %v981_v61 }
 0x11e   : > { %949 = vmatpush3.bf16.msra.mxu1 %v981_v61 }
 0x11f   : > { %942 = vmatprep.subr.bf16.mxu1 %v982_v62 }
 0x122   : > { %950 = vmatpush3.bf16.msra.mxu1 %v982_v62 }
 0x123   : > { %943 = vmatprep.subr.bf16.mxu1 %v983_v63 }
 0x126   : > { %951 = vmatpush3.bf16.msra.mxu1 %v983_v63 }
 0x127   : > { %944 = vmatprep.subr.bf16.mxu1 %v984_v0 }
 0x12a   : > { %952 = vmatpush3.bf16.msra.mxu1 %v984_v0 }
 0x1e0   : > { %v907_v2 = vpop.f32.mrb[0].mxu1 }
 0x1e1   : > { %v557_v3 = vadd.f32 %v907_v2, %v809_v1  ;;  %v548_v4 = vpop.f32.mrb[1].mxu1 }
 0x1e2   : > { %v549_v5 = vadd.f32 %v809_v1, %v548_v4  ;;  %v908_v6 = vpop.f32.mrb[2].mxu1 }
 0x1e3   : > { %1001 = vtanh.f32 %v557_v3  ;;  %v560_v7 = vadd.f32 %v908_v6, %v809_v1  ;;  %v551_v8 = vpop.f32.mrb[3].mxu1 }
 0x1e4   : > { %1003 = vtanh.f32 %v549_v5  ;;  %v552_v9 = vadd.f32 %v809_v1, %v551_v8 }
 0x1e5   : > { %1005 = vtanh.f32 %v560_v7 }
 0x1e6   : > { %1007 = vtanh.f32 %v552_v9 }
 0x1e8   : > { %v911_v10 = vpop.f32.mrb[4].mxu1 }
 0x1e9   : > { %v573_v11 = vadd.f32 %v911_v10, %v809_v1  ;;  %v564_v12 = vpop.f32.mrb[5].mxu1 }
 0x1ea   : > { %v565_v13 = vadd.f32 %v809_v1, %v564_v12  ;;  %v912_v14 = vpop.f32.mrb[6].mxu1 }
 0x1eb   : > { %1009 = vtanh.f32 %v573_v11  ;;  %v576_v15 = vadd.f32 %v912_v14, %v809_v1  ;;  %v567_v16 = vpop.f32.mrb[7].mxu1 }
 0x1ec   : > { %1011 = vtanh.f32 %v565_v13  ;;  %v568_v17 = vadd.f32 %v809_v1, %v567_v16 }
 0x1ed   : > { %v1002_v18 = vpop.eup %1001  ;;  %1013 = vtanh.f32 %v576_v15 }
 0x1ee   : > { %v1004_v19 = vpop.eup %1003  ;;  %1015 = vtanh.f32 %v568_v17 }
 0x1ef   : > { %v1006_v20 = vpop.eup %1005 }
 0x1f0   : > { %v1008_v21 = vpop.eup %1007  ;;  %v605_v22 = vpack.c.bf16 %v1006_v20, %v1002_v18 }
 0x1f1   : > { %v604_v23 = vpack.c.bf16 %v1008_v21, %v1004_v19 }
 0x1f3   : > { %929 = vmatprep.mubr.bf16.mxu0 %v604_v23 }
 0x1f4   : > { %930 = vmatmul.mubr.bf16.vlgmr.msra.gmra.mrb[8].mxu0 %v605_v22 }
 0x1f5   : > { %v1010_v24 = vpop.eup %1009 }
 0x1f6   : > { %v1012_v25 = vpop.eup %1011 }
 0x1f7   : > { %v1014_v26 = vpop.eup %1013 }
 0x1f8   : > { %v1016_v27 = vpop.eup %1015  ;;  %v607_v28 = vpack.c.bf16 %v1014_v26, %v1010_v24 }
 0x1f9   : > { %v606_v29 = vpack.c.bf16 %v1016_v27, %v1012_v25 }
 0x1fb   : > { %933 = vmatprep.mubr.bf16.mxu1 %v606_v29 }
 0x1fc   : > { %934 = vmatmul.mubr.bf16.vlgmr.msra.gmra.mrb[8].mxu1 %v607_v28 }
 0x2c7   : > { %v931_v31 = vpop.f32.mrb[8].mxu0 }
 0x2c8   : > { %v705_v32 = vadd.f32 %v931_v31, %v818_v30  ;;  %v696_v33 = vpop.f32.mrb[9].mxu0 }
 0x2c9   : > { %v697_v34 = vadd.f32 %v818_v30, %v696_v33  ;;  %v932_v35 = vpop.f32.mrb[10].mxu0 }
 0x2ca   : > { %729 = vst [vmem:[%s280_s25 + $0x10] sm:$0xff] %v705_v32  ;;  %v708_v36 = vadd.f32 %v932_v35, %v818_v30  ;;  %v699_v37 = vpop.f32.mrb[11].mxu0 }
 0x2cb   : > { %727 = vst [vmem:[%s280_s25] sm:$0xff] %v697_v34  ;;  %v700_v38 = vadd.f32 %v818_v30, %v699_v37 }
 0x2cc   : > { %730 = vst [vmem:[%s280_s25 + $0x18] sm:$0xff] %v708_v36 }
 0x2cd   : > { %728 = vst [vmem:[%s280_s25 + $0x8] sm:$0xff] %v700_v38 }
 0x2cf   : > { %v935_v39 = vpop.f32.mrb[8].mxu1 }
 0x2d0   : > { %v721_v40 = vadd.f32 %v935_v39, %v818_v30  ;;  %v712_v41 = vpop.f32.mrb[9].mxu1 }
 0x2d1   : > { %v713_v42 = vadd.f32 %v818_v30, %v712_v41  ;;  %v936_v43 = vpop.f32.mrb[10].mxu1 }
 0x2d2   : > { %733 = vst [vmem:[%s280_s25 + $0x30] sm:$0xff] %v721_v40  ;;  %v724_v44 = vadd.f32 %v936_v43, %v818_v30  ;;  %v715_v45 = vpop.f32.mrb[11].mxu1 }
 0x2d3   : > { %731 = vst [vmem:[%s280_s25 + $0x20] sm:$0xff] %v713_v42  ;;  %v716_v46 = vadd.f32 %v818_v30, %v715_v45 }
 0x2d4   : > { %734 = vst [vmem:[%s280_s25 + $0x38] sm:$0xff] %v724_v44 }
 0x2d5   : > { %732 = vst [vmem:[%s280_s25 + $0x28] sm:$0xff] %v716_v46 }
 0x2d6 PF: > { %s17_s24 = sadd.s32 1, %s1023_s24  }
 0x2d7   : > { %p14_p4 = scmp.ge.s32.totalorder %s17_s24, 6  }
 0x2d9   :  { %16 = sbr.rel (!%p14_p4) target bundleno = 1 (0x1), region = 78 }

</bundles_post_ra>
